<compile_context>
chip_gen: v6e
topology: v6e:2x2x1
jax: 0.10.0
libtpu: 0.0.40
codegen_flags: <defaults>
</compile_context>

<pallas_src>
import math
import jax
import jax.numpy as jnp
from jax.experimental import pallas as pl
from jax.experimental.pallas import tpu as pltpu

LANE = 128           # pad the feature (last) dim to this for unmasked full-vreg stores
ALIGN = 256          # row/col alignment (MXU-friendly, satisfies (8,128) tiling)
VMEM_LIMIT = 64 * 1024 * 1024


def _round_up(a, b):
    return ((a + b - 1) // b) * b


def _pick_tile(n, max_tile, align=ALIGN):
    """Largest multiple of `align` that divides round_up(n, align) and is <= max_tile."""
    q = _round_up(n, align) // align
    qmax = max(1, max_tile // align)
    best = 1
    for d in range(1, min(q, qmax) + 1):
        if q % d == 0:
            best = d
    return best * align


# ---------------------------------------------------------------------------
# Kernel 1:  H = x @ W + bias    (tiled over rows of x; H emitted in bf16)
# ---------------------------------------------------------------------------
def _xw_bias_kernel(x_ref, w_ref, b_ref, h_ref):
    # x_ref: (tm1, in_ft) f32, w_ref: (in_ft, F_p) f32, b_ref: (1, F_p) f32
    # h_ref: (tm1, F_p) bf16
    h = jnp.dot(x_ref[...], w_ref[...], preferred_element_type=jnp.float32)
    h_ref[...] = (h + b_ref[...]).astype(h_ref.dtype)  # f32 epilogue (v5e-safe), bf16 store


# ---------------------------------------------------------------------------
# Kernel 2:  out = G @ H   (rows x K-tiles, accumulate into resident f32 o_ref)
# ---------------------------------------------------------------------------
def _g_matmul_kernel(g_ref, h_ref, o_ref):
    # g_ref: (tm, tk) f32 or bf16, h_ref: (tk, F_p) bf16, o_ref: (tm, F_p) f32
    @pl.when(pl.program_id(1) == 0)
    def _init():
        o_ref[...] = jnp.zeros_like(o_ref)

    g = g_ref[...].astype(jnp.bfloat16)  # per-tile cast (no-op if already bf16)
    o_ref[...] += jnp.dot(g, h_ref[...], preferred_element_type=jnp.float32)


def hgnn_conv(x, G, weight, bias=None, *, tm=1024, tk=2048):
    """Pallas implementation of HGNN_conv.forward: G @ (x @ W + b).

    Note: G and the intermediate H are fed to the stage-2 MXU in bf16
    (accumulation stays f32) -- a deliberate precision tradeoff vs. the f32
    torch reference.
    """
    N, in_ft = x.shape
    out_ft = weight.shape[1]
    f32, bf16 = jnp.float32, jnp.bfloat16

    n_pad = _round_up(N, ALIGN)
    tm = _pick_tile(N, tm)          # divides n_pad by construction
    tk = _pick_tile(N, tk)          # divides n_pad by construction
    f_pad = _round_up(out_ft, LANE)

    # Stage-1 row tile: reuse tk, but cap so the (tm1, in_ft) f32 x block stays <= ~8 MiB.
    row_cap = max(ALIGN, ((8 * 1024 * 1024) // max(1, in_ft * 4)) // ALIGN * ALIGN)
    tm1 = _pick_tile(N, min(tk, row_cap))
    # TODO(synk): K-tile stage 1 over in_ft if in_ft ever grows so large that a
    # (256, in_ft) f32 block no longer fits VMEM.

    # ---- Pad / cast small parameters (cheap, done once) ----
    w_p = jnp.zeros((in_ft, f_pad), f32).at[:, :out_ft].set(weight.astype(f32))
    if bias is None:
        b_p = jnp.zeros((1, f_pad), f32)
    else:
        b_p = jnp.zeros((1, f_pad), f32).at[0, :out_ft].set(bias.astype(f32))

    if n_pad != N:
        # Ragged N: pad once. Fuse the pad with the bf16 cast for G so the extra
        # pass over the N^2 tensor is half-width.
        x_in = jnp.zeros((n_pad, in_ft), f32).at[:N, :].set(x.astype(f32))
        g_in = jnp.zeros((n_pad, n_pad), bf16).at[:N, :N].set(G.astype(bf16))
    else:
        # Aligned N: no copy of G at all -- feed f32 and cast per-tile in-kernel.
        x_in = x.astype(f32)
        g_in = G.astype(f32)

    # ---- Stage 1: H = x @ W + b  (bf16 output, consumed directly by stage 2) ----
    h = pl.pallas_call(
        _xw_bias_kernel,
        out_shape=jax.ShapeDtypeStruct((n_pad, f_pad), bf16),
        grid_spec=pltpu.PrefetchScalarGridSpec(
            num_scalar_prefetch=0,
            grid=(n_pad // tm1,),
            in_specs=[
                pl.BlockSpec((tm1, in_ft), lambda i: (i, 0)),
                pl.BlockSpec((in_ft, f_pad), lambda i: (0, 0)),   # grid-invariant
                pl.BlockSpec((1, f_pad), lambda i: (0, 0)),       # grid-invariant
            ],
            out_specs=pl.BlockSpec((tm1, f_pad), lambda i: (i, 0)),
        ),
        compiler_params=pltpu.CompilerParams(
            dimension_semantics=("parallel",),
            vmem_limit_bytes=VMEM_LIMIT),
    )(x_in, w_p, b_p)

    # ---- Stage 2: out = G @ H  (K-tiled, resident f32 output accumulator) ----
    out_p = pl.pallas_call(
        _g_matmul_kernel,
        out_shape=jax.ShapeDtypeStruct((n_pad, f_pad), f32),
        grid_spec=pltpu.PrefetchScalarGridSpec(
            num_scalar_prefetch=0,
            grid=(n_pad // tm, n_pad // tk),
            in_specs=[
                pl.BlockSpec((tm, tk), lambda i, k: (i, k)),
                pl.BlockSpec((tk, f_pad), lambda i, k: (k, 0)),
            ],
            out_specs=pl.BlockSpec((tm, f_pad), lambda i, k: (i, 0)),
        ),
        compiler_params=pltpu.CompilerParams(
            dimension_semantics=("parallel", "arbitrary"),
            vmem_limit_bytes=VMEM_LIMIT),
    )(g_in, h)

    return out_p[:N, :out_ft]


if __name__ == "__main__":
    # Small deterministic example: x:[N,in_ft], G:[N,N], weight:[in_ft,out_ft], bias:[out_ft]
    N, in_ft, out_ft = 256, 64, 32

    key = jax.random.PRNGKey(0)
    kx, kg, kw, kb, kmask = jax.random.split(key, 5)

    x = jax.random.normal(kx, (N, in_ft), dtype=jnp.float32)

    # Sparse-ish hypergraph propagation matrix G (torch.sparse.mm semantics == dense matmul).
    g_dense = jax.random.uniform(kg, (N, N), dtype=jnp.float32)
    g_mask = jax.random.bernoulli(kmask, p=0.1, shape=(N, N))
    G = jnp.where(g_mask, g_dense, 0.0)

    # reset_parameters(): uniform(-stdv, stdv), stdv = 1/sqrt(out_ft)
    stdv = 1.0 / math.sqrt(out_ft)
    weight = jax.random.uniform(kw, (in_ft, out_ft), dtype=jnp.float32,
                                minval=-stdv, maxval=stdv)
    bias = jax.random.uniform(kb, (out_ft,), dtype=jnp.float32,
                              minval=-stdv, maxval=stdv)

    out = hgnn_conv(x, G, weight, bias)
    out = jax.block_until_ready(out)

    # Reference in plain JAX (same math as the PyTorch forward, full f32).
    ref = G.astype(jnp.float32) @ (x @ weight + bias)
    assert out.shape == (N, out_ft)
    # bf16 G/H MXU feed (f32 accumulation) -> loosened tolerance vs f32 reference.
    assert jnp.allclose(out, ref, rtol=5e-2, atol=5e-2), (
        float(jnp.max(jnp.abs(out - ref))))

    print("KERNEL_OK")
</pallas_src>

<mosaic_0001>
module attributes {stable_mosaic.version = 11 : i64} {
  func.func @_xw_bias_kernel(%arg0: i32, %arg1: memref<256x64xf32, #tpu.memory_space<vmem>>, %arg2: memref<64x128xf32, #tpu.memory_space<vmem>>, %arg3: memref<1x128xf32, #tpu.memory_space<vmem>>, %arg4: memref<256x128xbf16, #tpu.memory_space<vmem>>) attributes {dimension_semantics = [#tpu.dimension_semantics<parallel>], iteration_bounds = array<i64: 1>, scalar_prefetch = 0 : i64, scratch_operands = 0 : i64, tpu.core_type = #tpu.core_type<tc>, window_params = [{transform_indices = @transform_0, window_bounds = array<i64: 256, 64>}, {pipeline_mode = #tpu.pipeline_mode<synchronous>, transform_indices = @transform_1, window_bounds = array<i64: 64, 128>}, {pipeline_mode = #tpu.pipeline_mode<synchronous>, transform_indices = @transform_2, window_bounds = array<i64: 1, 128>}, {transform_indices = @transform_3, window_bounds = array<i64: 256, 128>}]} {
    %c0 = arith.constant 0 : index
    %c0_0 = arith.constant 0 : index
    %0 = vector.load %arg1[%c0, %c0_0] : memref<256x64xf32, #tpu.memory_space<vmem>>, vector<256x64xf32>
    %c0_1 = arith.constant 0 : index
    %c0_2 = arith.constant 0 : index
    %1 = vector.load %arg2[%c0_1, %c0_2] : memref<64x128xf32, #tpu.memory_space<vmem>>, vector<64x128xf32>
    %cst = arith.constant dense<0.000000e+00> : vector<256x128xf32>
    %2 = tpu.matmul %0, %1, %cst {dimension_numbers = #tpu.dot_dimension_numbers<[1], [0], [0], [1], [0, 0, 1, 1], [], []>} : vector<256x64xf32>, vector<64x128xf32>, vector<256x128xf32> -> vector<256x128xf32>
    %c0_3 = arith.constant 0 : index
    %c0_4 = arith.constant 0 : index
    %3 = vector.load %arg3[%c0_3, %c0_4] : memref<1x128xf32, #tpu.memory_space<vmem>>, vector<1x128xf32>
    %4 = vector.broadcast %3 : vector<1x128xf32> to vector<256x128xf32>
    %5 = arith.addf %2, %4 : vector<256x128xf32>
    %6 = arith.truncf %5 : vector<256x128xf32> to vector<256x128xbf16>
    %c0_5 = arith.constant 0 : index
    %c0_6 = arith.constant 0 : index
    %7 = vector.load %arg4[%c0_5, %c0_6] : memref<256x128xbf16, #tpu.memory_space<vmem>>, vector<256x128xbf16>
    tpu.vector_store %arg4[%c0_5, %c0_6], %6 {strides = array<i32>} : memref<256x128xbf16, #tpu.memory_space<vmem>>, vector<256x128xbf16>,
    return
  }
  func.func @transform_0(%arg0: i32) -> (i32, i32) {
    %c0_i32 = arith.constant 0 : i32
    %c0_i32_0 = arith.constant 0 : i32
    return %arg0, %c0_i32 : i32, i32
  }
  func.func @transform_1(%arg0: i32) -> (i32, i32) {
    %c0_i32 = arith.constant 0 : i32
    %c0_i32_0 = arith.constant 0 : i32
    %c0_i32_1 = arith.constant 0 : i32
    return %c0_i32, %c0_i32_0 : i32, i32
  }
  func.func @transform_2(%arg0: i32) -> (i32, i32) {
    %c0_i32 = arith.constant 0 : i32
    %c0_i32_0 = arith.constant 0 : i32
    %c0_i32_1 = arith.constant 0 : i32
    return %c0_i32, %c0_i32_0 : i32, i32
  }
  func.func @transform_3(%arg0: i32) -> (i32, i32) {
    %c0_i32 = arith.constant 0 : i32
    %c0_i32_0 = arith.constant 0 : i32
    return %arg0, %c0_i32 : i32, i32
  }
}

</mosaic_0001>

<bundles_post_ra>
// kernel: tpu_custom_call.1
= control target key start
LH: loop header
LB: loop body
LE: loop exit
PB: predicated region body
PF: predicated region fallthrough
CT: control target
= control target key end

     0   :  { %s1112_s0 = inlined_call_operand.vmem [shape: f32[256,64], index: 0, kind: input, shape index: {}]   ;;  %s1113_s1 = inlined_call_operand.vmem [shape: f32[64,128], index: 1, kind: input, shape index: {}]   ;;  %s1114_s2 = inlined_call_operand.vmem [shape: f32[1,128], index: 2, kind: input, shape index: {}]   ;;  %s1115_s3 = inlined_call_operand.hbm [shape: bf16[256,128], index: 3, kind: output, shape index: {}]  }
   0x1   :  { %v54_v0 = vld [vmem:[%s1113_s1 + $0x38] sm:$0xff]  ;;  %v53_v1 = vld [vmem:[%s1113_s1 + $0x30] sm:$0xff]  ;;  %v52_v2 = vld [vmem:[%s1113_s1 + $0x28] sm:$0xff] }
   0x2   :  { %792 = vmatprep.subr.mxu0 %v54_v0  ;;  %856 = vmatprep.subr.mxu1 %v54_v0  ;;  %v51_v3 = vld [vmem:[%s1113_s1 + $0x20] sm:$0xff]  ;;  %v50_v4 = vld [vmem:[%s1113_s1 + $0x18] sm:$0xff]  ;;  %v49_v5 = vld [vmem:[%s1113_s1 + $0x10] sm:$0xff] }
   0x3   :  { %793 = vmatpush3.msra.mxu0 %v54_v0  ;;  %864 = vmatpush3.msra.mxu1 %v54_v0  ;;  %v48_v6 = vld [vmem:[%s1113_s1 + $0x8] sm:$0xff]  ;;  %v47_v7 = vld [vmem:[%s1113_s1] sm:$0xff] }
   0x4   :  { %794 = vmatprep.subr.mxu0 %v53_v1  ;;  %857 = vmatprep.subr.mxu1 %v53_v1 }
   0x5   :  { %795 = vmatpush3.msra.mxu0 %v53_v1  ;;  %865 = vmatpush3.msra.mxu1 %v53_v1 }
   0x6   :  { %796 = vmatprep.subr.mxu0 %v52_v2  ;;  %858 = vmatprep.subr.mxu1 %v52_v2 }
   0x7   :  { %797 = vmatpush3.msra.mxu0 %v52_v2  ;;  %866 = vmatpush3.msra.mxu1 %v52_v2 }
   0x8   :  { %798 = vmatprep.subr.mxu0 %v51_v3  ;;  %859 = vmatprep.subr.mxu1 %v51_v3 }
   0x9   :  { %799 = vmatpush3.msra.mxu0 %v51_v3  ;;  %867 = vmatpush3.msra.mxu1 %v51_v3 }
   0xa   :  { %800 = vmatprep.subr.mxu0 %v50_v4  ;;  %860 = vmatprep.subr.mxu1 %v50_v4 }
   0xb   :  { %801 = vmatpush3.msra.mxu0 %v50_v4  ;;  %868 = vmatpush3.msra.mxu1 %v50_v4 }
   0xc   :  { %802 = vmatprep.subr.mxu0 %v49_v5  ;;  %861 = vmatprep.subr.mxu1 %v49_v5 }
   0xd   :  { %803 = vmatpush3.msra.mxu0 %v49_v5  ;;  %869 = vmatpush3.msra.mxu1 %v49_v5 }
   0xe   :  { %804 = vmatprep.subr.mxu0 %v48_v6  ;;  %862 = vmatprep.subr.mxu1 %v48_v6 }
   0xf   :  { %8 = vsyncpa [#allocation3], 0  ;;  %805 = vmatpush3.msra.mxu0 %v48_v6  ;;  %870 = vmatpush3.msra.mxu1 %v48_v6  ;;  %v15_v8 = vld [vmem:[%s1112_s0] sm:$0xff]  ;;  %vm62_vm0 = vcmask 523264   ;;  %v16_v10 = vld [vmem:[%s1112_s0 + $0x8] sm:$0xff] }
  0x10   :  { %v31_v9 = vld [vmem:[%s1112_s0 + $0x80] sm:$0xff]  ;;  %806 = vmatprep.subr.mxu0 %v47_v7  ;;  %863 = vmatprep.subr.mxu1 %v47_v7  ;;  %v32_v11 = vld [vmem:[%s1112_s0 + $0x88] sm:$0xff]  ;;  %v17_v12 = vld [vmem:[%s1112_s0 + $0x10] sm:$0xff] }
  0x11   :  { %807 = vmatpush3.msra.mxu0 %v47_v7  ;;  %871 = vmatpush3.msra.mxu1 %v47_v7  ;;  %v33_v13 = vld [vmem:[%s1112_s0 + $0x90] sm:$0xff]  ;;  %v18_v14 = vld [vmem:[%s1112_s0 + $0x18] sm:$0xff]  ;;  %v19_v16 = vld [vmem:[%s1112_s0 + $0x20] sm:$0xff] }
  0x12   :  { %808 = vmatprep.mubr.msk.f32.mxu0 %vm62_vm0, %v15_v8  ;;  %832 = vmatprep.mubr.msk.f32.mxu1 %vm62_vm0, %v31_v9  ;;  %v34_v15 = vld [vmem:[%s1112_s0 + $0x98] sm:$0xff]  ;;  %v35_v17 = vld [vmem:[%s1112_s0 + $0xa0] sm:$0xff]  ;;  %v20_v18 = vld [vmem:[%s1112_s0 + $0x28] sm:$0xff] }
  0x13   :  { %809 = vmatmul.mubr.msk.f32.vlgmr.msra.gmra.mxu0 %vm62_vm0, %v16_v10  ;;  %833 = vmatmul.mubr.msk.f32.vlgmr.msra.gmra.mxu1 %vm62_vm0, %v32_v11  ;;  %v36_v19 = vld [vmem:[%s1112_s0 + $0xa8] sm:$0xff]  ;;  %v21_v20 = vld [vmem:[%s1112_s0 + $0x30] sm:$0xff]  ;;  %v22_v22 = vld [vmem:[%s1112_s0 + $0x38] sm:$0xff] }
  0x14   :  { %811 = vmatprep.mubr.msk.f32.mxu0 %vm62_vm0, %v17_v12  ;;  %835 = vmatprep.mubr.msk.f32.mxu1 %vm62_vm0, %v33_v13  ;;  %v37_v21 = vld [vmem:[%s1112_s0 + $0xb0] sm:$0xff]  ;;  %v38_v23 = vld [vmem:[%s1112_s0 + $0xb8] sm:$0xff]  ;;  %v23_v24 = vld [vmem:[%s1112_s0 + $0x40] sm:$0xff] }
  0x15   :  { %v39_v25 = vld [vmem:[%s1112_s0 + $0xc0] sm:$0xff]  ;;  %v24_v26 = vld [vmem:[%s1112_s0 + $0x48] sm:$0xff]  ;;  %v25_v28 = vld [vmem:[%s1112_s0 + $0x50] sm:$0xff] }
  0x16   :  { %v40_v27 = vld [vmem:[%s1112_s0 + $0xc8] sm:$0xff]  ;;  %v41_v29 = vld [vmem:[%s1112_s0 + $0xd0] sm:$0xff]  ;;  %v26_v30 = vld [vmem:[%s1112_s0 + $0x58] sm:$0xff] }
  0x17   :  { %812 = vmatmul.mubr.msk.f32.gmra.mxu0 %vm62_vm0, %v18_v14  ;;  %836 = vmatmul.mubr.msk.f32.gmra.mxu1 %vm62_vm0, %v34_v15  ;;  %v42_v31 = vld [vmem:[%s1112_s0 + $0xd8] sm:$0xff]  ;;  %v27_v32 = vld [vmem:[%s1112_s0 + $0x60] sm:$0xff]  ;;  %v28_v34 = vld [vmem:[%s1112_s0 + $0x68] sm:$0xff] }
  0x18   :  { %814 = vmatprep.mubr.msk.f32.mxu0 %vm62_vm0, %v19_v16  ;;  %838 = vmatprep.mubr.msk.f32.mxu1 %vm62_vm0, %v35_v17  ;;  %v43_v33 = vld [vmem:[%s1112_s0 + $0xe0] sm:$0xff]  ;;  %v44_v35 = vld [vmem:[%s1112_s0 + $0xe8] sm:$0xff]  ;;  %v29_v36 = vld [vmem:[%s1112_s0 + $0x70] sm:$0xff] }
  0x19   :  { %v45_v37 = vld [vmem:[%s1112_s0 + $0xf0] sm:$0xff]  ;;  %v30_v38 = vld [vmem:[%s1112_s0 + $0x78] sm:$0xff]  ;;  %v1075_v41 = vld [vmem:[%s1114_s2] ss:$0 sm:$0xff] }
  0x1a   :  { %v46_v39 = vld [vmem:[%s1112_s0 + $0xf8] sm:$0xff]  ;;  %s897_s0 = smov [#allocation2]  }
  0x1b   :  { %815 = vmatmul.mubr.msk.f32.gmra.mxu0 %vm62_vm0, %v20_v18  ;;  %839 = vmatmul.mubr.msk.f32.gmra.mxu1 %vm62_vm0, %v36_v19  ;;  %s549_s2 = sshll.u32 %s897_s0, 4  ;;  %s550_s2 = int_to_ptr.vmem [resolvable:$true] %s549_s2 }
  0x1c   :  { %817 = vmatprep.mubr.msk.f32.mxu0 %vm62_vm0, %v21_v20  ;;  %841 = vmatprep.mubr.msk.f32.mxu1 %vm62_vm0, %v37_v21  ;;  %s875_s10 = scalar_lea.vmem %s550_s2, 2048  ;;  %p880_p1 = scmp.lt.s32.totalorder %s550_s2, %s550_s2 }
  0x1d   :  { %p876_p0 = scmp.ne.s32.totalorder %s550_s2, %s875_s10  ;;  %p881_p2 = scmp.lt.s32.totalorder %s875_s10, %s875_s10 }
  0x1f   :  { %818 = vmatmul.mubr.msk.f32.gmra.mxu0 %vm62_vm0, %v22_v22  ;;  %842 = vmatmul.mubr.msk.f32.gmra.mxu1 %vm62_vm0, %v38_v23  ;;  %p882_p3 = por %p881_p2, %p880_p1 }
  0x20   :  { %820 = vmatprep.mubr.msk.f32.mxu0 %vm62_vm0, %v23_v24  ;;  %844 = vmatprep.mubr.msk.f32.mxu1 %vm62_vm0, %v39_v25 }
  0x21   :  { %p883_p4 = pnand %p882_p3, %p876_p0 }
  0x23   :  { %821 = vmatmul.mubr.msk.f32.gmra.mxu0 %vm62_vm0, %v24_v26  ;;  %845 = vmatmul.mubr.msk.f32.gmra.mxu1 %vm62_vm0, %v40_v27 }
  0x24   :  { %823 = vmatprep.mubr.msk.f32.mxu0 %vm62_vm0, %v25_v28  ;;  %847 = vmatprep.mubr.msk.f32.mxu1 %vm62_vm0, %v41_v29 }
  0x27   :  { %824 = vmatmul.mubr.msk.f32.gmra.mxu0 %vm62_vm0, %v26_v30  ;;  %848 = vmatmul.mubr.msk.f32.gmra.mxu1 %vm62_vm0, %v42_v31 }
  0x28   :  { %826 = vmatprep.mubr.msk.f32.mxu0 %vm62_vm0, %v27_v32  ;;  %850 = vmatprep.mubr.msk.f32.mxu1 %vm62_vm0, %v43_v33 }
  0x2b   :  { %827 = vmatmul.mubr.msk.f32.gmra.mxu0 %vm62_vm0, %v28_v34  ;;  %851 = vmatmul.mubr.msk.f32.gmra.mxu1 %vm62_vm0, %v44_v35 }
  0x2c   :  { %829 = vmatprep.mubr.msk.f32.mxu0 %vm62_vm0, %v29_v36  ;;  %853 = vmatprep.mubr.msk.f32.mxu1 %vm62_vm0, %v45_v37 }
  0x2f   :  { %830 = vmatmul.mubr.msk.f32.gmra.mxu0 %vm62_vm0, %v30_v38  ;;  %854 = vmatmul.mubr.msk.f32.gmra.mxu1 %vm62_vm0, %v46_v39 }
  0xd3   :  { %v810_v40 = vpop.f32.mrf.mxu0  ;;  %v834_v42 = vpop.f32.mrf.mxu1 }
  0xd4   :  { %v231_v45 = vadd.f32 %v810_v40, %v1075_v41  ;;  %v311_v46 = vadd.f32 %v834_v42, %v1075_v41 }
  0xd5   :  { %v225_v43 = vpop.f32.mrf.mxu0  ;;  %v305_v44 = vpop.f32.mrf.mxu1 }
  0xd6   :  { %v226_v47 = vadd.f32 %v1075_v41, %v225_v43  ;;  %v306_v48 = vadd.f32 %v1075_v41, %v305_v44 }
  0xd7   :  { %v813_v49 = vpop.f32.mrf.mxu0  ;;  %v837_v50 = vpop.f32.mrf.mxu1 }
  0xd8   :  { %v660_v51 = vpack.c.bf16 %v231_v45, %v226_v47  ;;  %v700_v52 = vpack.c.bf16 %v311_v46, %v306_v48  ;;  %v241_v55 = vadd.f32 %v813_v49, %v1075_v41  ;;  %v321_v56 = vadd.f32 %v837_v50, %v1075_v41 }
  0xd9   :  { %v235_v53 = vpop.f32.mrf.mxu0  ;;  %v315_v54 = vpop.f32.mrf.mxu1 }
  0xda   :  { %661 = vst [vmem:[#allocation2] sm:$0xff] %v660_v51   ;;  %744 = vst [vmem:[#allocation2 + $0x40] sm:$0xff] %v700_v52   ;;  %v236_v57 = vadd.f32 %v1075_v41, %v235_v53  ;;  %v316_v58 = vadd.f32 %v1075_v41, %v315_v54 }
  0xdb   :  { %v816_v59 = vpop.f32.mrf.mxu0  ;;  %v840_v60 = vpop.f32.mrf.mxu1 }
  0xdc   :  { %v665_v61 = vpack.c.bf16 %v241_v55, %v236_v57  ;;  %v705_v62 = vpack.c.bf16 %v321_v56, %v316_v58  ;;  %v251_v1 = vadd.f32 %v816_v59, %v1075_v41  ;;  %v331_v2 = vadd.f32 %v840_v60, %v1075_v41 }
  0xdd   :  { %v245_v63 = vpop.f32.mrf.mxu0  ;;  %v325_v0 = vpop.f32.mrf.mxu1 }
  0xde   :  { %737 = vst [vmem:[#allocation2 + $0x8] sm:$0xff] %v665_v61   ;;  %745 = vst [vmem:[#allocation2 + $0x48] sm:$0xff] %v705_v62   ;;  %v246_v3 = vadd.f32 %v1075_v41, %v245_v63  ;;  %v326_v4 = vadd.f32 %v1075_v41, %v325_v0 }
  0xdf   :  { %v819_v5 = vpop.f32.mrf.mxu0  ;;  %v843_v6 = vpop.f32.mrf.mxu1 }
  0xe0   :  { %v670_v7 = vpack.c.bf16 %v251_v1, %v246_v3  ;;  %v710_v8 = vpack.c.bf16 %v331_v2, %v326_v4  ;;  %v261_v11 = vadd.f32 %v819_v5, %v1075_v41  ;;  %v341_v12 = vadd.f32 %v843_v6, %v1075_v41 }
  0xe1   :  { %v255_v9 = vpop.f32.mrf.mxu0  ;;  %v335_v10 = vpop.f32.mrf.mxu1 }
  0xe2   :  { %738 = vst [vmem:[#allocation2 + $0x10] sm:$0xff] %v670_v7   ;;  %746 = vst [vmem:[#allocation2 + $0x50] sm:$0xff] %v710_v8   ;;  %v256_v13 = vadd.f32 %v1075_v41, %v255_v9  ;;  %v336_v14 = vadd.f32 %v1075_v41, %v335_v10 }
  0xe3   :  { %v822_v15 = vpop.f32.mrf.mxu0  ;;  %v846_v16 = vpop.f32.mrf.mxu1 }
  0xe4   :  { %v675_v17 = vpack.c.bf16 %v261_v11, %v256_v13  ;;  %v715_v18 = vpack.c.bf16 %v341_v12, %v336_v14  ;;  %v271_v21 = vadd.f32 %v822_v15, %v1075_v41  ;;  %v351_v22 = vadd.f32 %v846_v16, %v1075_v41 }
  0xe5   :  { %v265_v19 = vpop.f32.mrf.mxu0  ;;  %v345_v20 = vpop.f32.mrf.mxu1 }
  0xe6   :  { %739 = vst [vmem:[#allocation2 + $0x18] sm:$0xff] %v675_v17   ;;  %747 = vst [vmem:[#allocation2 + $0x58] sm:$0xff] %v715_v18   ;;  %v266_v23 = vadd.f32 %v1075_v41, %v265_v19  ;;  %v346_v24 = vadd.f32 %v1075_v41, %v345_v20 }
  0xe7   :  { %v825_v25 = vpop.f32.mrf.mxu0  ;;  %v849_v26 = vpop.f32.mrf.mxu1 }
  0xe8   :  { %v680_v27 = vpack.c.bf16 %v271_v21, %v266_v23  ;;  %v720_v28 = vpack.c.bf16 %v351_v22, %v346_v24  ;;  %v281_v31 = vadd.f32 %v825_v25, %v1075_v41  ;;  %v361_v32 = vadd.f32 %v849_v26, %v1075_v41 }
  0xe9   :  { %v275_v29 = vpop.f32.mrf.mxu0  ;;  %v355_v30 = vpop.f32.mrf.mxu1 }
  0xea   :  { %740 = vst [vmem:[#allocation2 + $0x20] sm:$0xff] %v680_v27   ;;  %748 = vst [vmem:[#allocation2 + $0x60] sm:$0xff] %v720_v28   ;;  %v276_v33 = vadd.f32 %v1075_v41, %v275_v29  ;;  %v356_v34 = vadd.f32 %v1075_v41, %v355_v30 }
  0xeb   :  { %v828_v35 = vpop.f32.mrf.mxu0  ;;  %v852_v36 = vpop.f32.mrf.mxu1 }
  0xec   :  { %v685_v37 = vpack.c.bf16 %v281_v31, %v276_v33  ;;  %v725_v38 = vpack.c.bf16 %v361_v32, %v356_v34  ;;  %v291_v42 = vadd.f32 %v828_v35, %v1075_v41  ;;  %v371_v43 = vadd.f32 %v852_v36, %v1075_v41 }
  0xed   :  { %v285_v39 = vpop.f32.mrf.mxu0  ;;  %v365_v40 = vpop.f32.mrf.mxu1 }
  0xee   :  { %741 = vst [vmem:[#allocation2 + $0x28] sm:$0xff] %v685_v37   ;;  %749 = vst [vmem:[#allocation2 + $0x68] sm:$0xff] %v725_v38   ;;  %v286_v44 = vadd.f32 %v1075_v41, %v285_v39  ;;  %v366_v45 = vadd.f32 %v1075_v41, %v365_v40 }
  0xef   :  { %v831_v46 = vpop.f32.mrf.mxu0  ;;  %v855_v47 = vpop.f32.mrf.mxu1 }
  0xf0   :  { %v690_v48 = vpack.c.bf16 %v291_v42, %v286_v44  ;;  %v730_v49 = vpack.c.bf16 %v371_v43, %v366_v45  ;;  %v301_v52 = vadd.f32 %v831_v46, %v1075_v41  ;;  %v381_v53 = vadd.f32 %v855_v47, %v1075_v41 }
  0xf1   :  { %v295_v50 = vpop.f32.mrf.mxu0  ;;  %v375_v51 = vpop.f32.mrf.mxu1 }
  0xf2   :  { %742 = vst [vmem:[#allocation2 + $0x30] sm:$0xff] %v690_v48   ;;  %750 = vst [vmem:[#allocation2 + $0x70] sm:$0xff] %v730_v49   ;;  %v296_v54 = vadd.f32 %v1075_v41, %v295_v50  ;;  %v376_v55 = vadd.f32 %v1075_v41, %v375_v51 }
  0xf4   :  { %v695_v56 = vpack.c.bf16 %v301_v52, %v296_v54  ;;  %v735_v57 = vpack.c.bf16 %v381_v53, %v376_v55 }
  0xf6   :  { %743 = vst [vmem:[#allocation2 + $0x38] sm:$0xff] %v695_v56   ;;  %751 = vst [vmem:[#allocation2 + $0x78] sm:$0xff] %v735_v57  }
  0xf7   :  { %886 = shalt.err (!%p883_p4)
}
  0xf8   :  { %s898_s11 = smov 64   ;;  %s899_s12 = smov 4  }
  0xf9   :  { %555 = dma.vmem_to_hbm [thread:$0]  %s550_s2, 2048, %s1115_s3, [#allocation3], %s898_s11, %s898_s11, %s899_s12  }
  0xfa   :  { %895 = dma.done.wait [#allocation3], 2048  }
  0xfb   :  { %896 = vsyncadd [#allocation3], 4294965248 }
  0xfc   :  { %559 = vsyncpa [#allocation3], 1 }

</bundles_post_ra>
